<compile_context>
chip_gen: v6e
topology: v6e:2x2x1
jax: 0.10.0
libtpu: 0.0.40
codegen_flags: <defaults>
</compile_context>

<pallas_src>
import jax
import jax.numpy as jnp
from jax.experimental import pallas as pl
from jax.experimental.pallas import tpu as pltpu

_LANES = 128
_ACC_ROWS = 8                      # f32 accumulator sublanes (one vreg tall)
_DEFAULT_MAX_TILE_ROWS = 4096      # 4096*128*4B = 2 MiB per f32 input tile


def _cdiv(a: int, b: int) -> int:
    return -(-a // b)


def _round_up(x: int, m: int) -> int:
    return _cdiv(x, m) * m


def _col_l1_sum_kernel(p_ref, t_ref, out_ref, acc_ref):
    """Accumulate sum(|p - t|) over the reduction ("arbitrary") grid axis.

    p_ref / t_ref: (block_rows, 128) tiles in VMEM, original dtype.
    out_ref:       (1, 1) f32 SMEM block -- partial sum for this parallel split.
    acc_ref:       (8, 128) f32 VMEM scratch, resident across grid steps.
    """
    k = pl.program_id(1)

    @pl.when(k == 0)
    def _init():
        acc_ref[...] = jnp.zeros_like(acc_ref)

    # Cast in-register (keeps the HBM DMA narrow for bf16 inputs).
    d = jnp.abs(p_ref[...].astype(jnp.float32) - t_ref[...].astype(jnp.float32))
    rows = d.shape[0]
    # Fold the (rows, 128) tile onto the (8, 128) accumulator with pure VPU
    # adds (tile-aligned reshape => no data movement).  Cross-lane reduce and
    # the scalar SMEM store are deferred to the last step.
    acc_ref[...] += d.reshape(rows // _ACC_ROWS, _ACC_ROWS, _LANES).sum(axis=0)

    @pl.when(k == pl.num_programs(1) - 1)
    def _finalize():
        out_ref[0, 0] = jnp.sum(acc_ref[...])


def col_l1_loss(preds: jax.Array,
                targets: jax.Array,
                *,
                use_pallas: bool | None = None,
                max_tile_rows: int = _DEFAULT_MAX_TILE_ROWS) -> jax.Array:
    """Pallas equivalent of ColL1Loss(num_targets=preds.shape[1])(preds, targets)."""
    assert preds.shape == targets.shape and preds.ndim == 2
    B, T = preds.shape
    assert T != 0
    n = B * T
    itemsize = jnp.dtype(preds.dtype).itemsize

    if use_pallas is None:
        # Tiny problem: kernel-launch + per-step overhead dwarfs moving a few
        # KiB; let XLA fuse the trivial reduction instead.
        use_pallas = 2 * n * itemsize >= (1 << 20)
    if not use_pallas:
        return jnp.mean(jnp.abs(preds.astype(jnp.float32)
                                - targets.astype(jnp.float32)))

    # --- plan the lane-dense tiling ------------------------------------------
    # Row granularity keeps blocks sublane-pack aligned: 8 (f32) / 16 (bf16).
    row_gran = max(_ACC_ROWS, _ACC_ROWS * 4 // itemsize)
    rows = _cdiv(n, _LANES)
    total_tiles = max(1, _cdiv(rows, max_tile_rows))
    # Two "parallel" halves so v7x can shard across its 2 TensorCores.
    num_splits = 2 if total_tiles >= 2 else 1
    tiles_per_split = _cdiv(total_tiles, num_splits)
    block_rows = _round_up(_cdiv(rows, num_splits * tiles_per_split), row_gran)
    rows_pad = num_splits * tiles_per_split * block_rows
    n_pad = rows_pad * _LANES

    def _to_lane_dense(x):
        flat = x.reshape(-1)
        if n_pad != n:
            # Zero padding in BOTH operands => |0 - 0| = 0 contribution.
            flat = jnp.pad(flat, (0, n_pad - n))
        return flat.reshape(rows_pad, _LANES)

    p2d = _to_lane_dense(preds)
    t2d = _to_lane_dense(targets)

    in_spec = pl.BlockSpec((block_rows, _LANES),
                           lambda c, k: (c * tiles_per_split + k, 0))

    partials = pl.pallas_call(
        _col_l1_sum_kernel,
        out_shape=jax.ShapeDtypeStruct((num_splits, 1), jnp.float32),
        grid=(num_splits, tiles_per_split),
        in_specs=[in_spec, in_spec],
        out_specs=pl.BlockSpec((1, 1), lambda c, k: (c, 0),
                               memory_space=pltpu.SMEM),
        scratch_shapes=[pltpu.VMEM((_ACC_ROWS, _LANES), jnp.float32)],
        compiler_params=pltpu.CompilerParams(
            dimension_semantics=("parallel", "arbitrary"),
            # 2 inputs x 2 pipeline buffers x 2 MiB f32 tiles ~= 8 MiB;
            # 32 MiB is safe on v5e/v6e (128 MiB VMEM) and v7x (64 MiB).
            vmem_limit_bytes=32 * 1024 * 1024),
    )(p2d, t2d)

    # Scale by the TRUE element count (padding contributed zero).
    return jnp.sum(partials) / jnp.float32(n)


def _reference(preds, targets):
    """Exact PyTorch-loop semantics (per-column mean, then sum, then /T)."""
    B, T = preds.shape
    p = preds.astype(jnp.float32)
    t = targets.astype(jnp.float32)
    l1 = jnp.float32(0.0)
    for i in range(T):
        l1 = l1 + jnp.mean(jnp.abs(p[:, i] - t[:, i]))
    return l1 / T


if __name__ == "__main__":
    key = jax.random.PRNGKey(0)

    # 1) Small demo shape (matches the module's (batch, num_targets) usage);
    #    force the Pallas path so the kernel is exercised.
    kp, kt, key = jax.random.split(key, 3)
    B, T = 8, 4
    preds = jax.random.normal(kp, (B, T), dtype=jnp.float32)
    targets = jax.random.normal(kt, (B, T), dtype=jnp.float32)
    loss = col_l1_loss(preds, targets, use_pallas=True)
    jax.block_until_ready(loss)
    assert jnp.allclose(loss, _reference(preds, targets), rtol=1e-5, atol=1e-5)

    # 2) Non-divisible medium shape with a small tile so the grid has
    #    (parallel=2, arbitrary=2) steps: exercises tiling, the resident
    #    accumulator, the parallel split and the zero-pad masking.
    kp, kt, key = jax.random.split(key, 3)
    B2, T2 = 517, 37
    p2 = jax.random.normal(kp, (B2, T2), dtype=jnp.float32)
    t2 = jax.random.normal(kt, (B2, T2), dtype=jnp.float32)
    loss2 = col_l1_loss(p2, t2, use_pallas=True, max_tile_rows=64)
    jax.block_until_ready(loss2)
    assert jnp.allclose(loss2, _reference(p2, t2), rtol=1e-5, atol=1e-5)

    # 3) bf16 inputs stay bf16 through the DMA; cast happens inside the kernel.
    kp, kt, key = jax.random.split(key, 3)
    B3, T3 = 200, 19
    p3 = jax.random.normal(kp, (B3, T3), dtype=jnp.bfloat16)
    t3 = jax.random.normal(kt, (B3, T3), dtype=jnp.bfloat16)
    loss3 = col_l1_loss(p3, t3, use_pallas=True, max_tile_rows=32)
    jax.block_until_ready(loss3)
    assert jnp.allclose(loss3, _reference(p3, t3), rtol=1e-5, atol=1e-5)

    # 4) Auto-dispatch: tiny inputs take the plain-jnp fast path.
    loss4 = col_l1_loss(preds, targets)  # use_pallas=None -> jnp path here
    jax.block_until_ready(loss4)
    assert jnp.allclose(loss4, _reference(preds, targets), rtol=1e-5, atol=1e-5)

    print("KERNEL_OK")
</pallas_src>

<mosaic_0001>
module attributes {stable_mosaic.version = 11 : i64} {
  func.func @_col_l1_sum_kernel(%arg0: i32, %arg1: i32, %arg2: memref<8x128xf32, #tpu.memory_space<vmem>>, %arg3: memref<8x128xf32, #tpu.memory_space<vmem>>, %arg4: memref<1x1xf32, #tpu.memory_space<smem>>, %arg5: memref<8x128xf32, #tpu.memory_space<vmem>>) attributes {dimension_semantics = [#tpu.dimension_semantics<parallel>, #tpu.dimension_semantics<arbitrary>], iteration_bounds = array<i64: 1, 1>, scalar_prefetch = 0 : i64, scratch_operands = 1 : i64, tpu.core_type = #tpu.core_type<tc>, window_params = [{transform_indices = @transform_0, window_bounds = array<i64: 8, 128>}, {transform_indices = @transform_1, window_bounds = array<i64: 8, 128>}, {transform_indices = @transform_2, window_bounds = array<i64: 1, 1>}]} {
    %c0_i32 = arith.constant 0 : i32
    %0 = arith.cmpi eq, %arg1, %c0_i32 : i32
    %1 = arith.extui %0 : i1 to i32
    %c0_i32_0 = arith.constant 0 : i32
    %2 = arith.cmpi ne, %1, %c0_i32_0 : i32
    scf.if %2 {
      %cst_10 = arith.constant 0.000000e+00 : f32
      %15 = vector.broadcast %cst_10 : f32 to vector<8x128xf32>
      %c0_11 = arith.constant 0 : index
      %c0_12 = arith.constant 0 : index
      %16 = vector.load %arg5[%c0_11, %c0_12] : memref<8x128xf32, #tpu.memory_space<vmem>>, vector<8x128xf32>
      tpu.vector_store %arg5[%c0_11, %c0_12], %15 {strides = array<i32>} : memref<8x128xf32, #tpu.memory_space<vmem>>, vector<8x128xf32>,
    } else {
    }
    %c0 = arith.constant 0 : index
    %c0_1 = arith.constant 0 : index
    %3 = vector.load %arg2[%c0, %c0_1] : memref<8x128xf32, #tpu.memory_space<vmem>>, vector<8x128xf32>
    %c0_2 = arith.constant 0 : index
    %c0_3 = arith.constant 0 : index
    %4 = vector.load %arg3[%c0_2, %c0_3] : memref<8x128xf32, #tpu.memory_space<vmem>>, vector<8x128xf32>
    %5 = arith.subf %3, %4 : vector<8x128xf32>
    %6 = math.absf %5 : vector<8x128xf32>
    %c0_4 = arith.constant 0 : index
    %c0_5 = arith.constant 0 : index
    %7 = vector.load %arg5[%c0_4, %c0_5] : memref<8x128xf32, #tpu.memory_space<vmem>>, vector<8x128xf32>
    %8 = vector.shape_cast %6 : vector<8x128xf32> to vector<1x8x128xf32>
    %cst = arith.constant dense<0.000000e+00> : vector<8x128xf32>
    %9 = vector.multi_reduction <add>, %8, %cst [0] : vector<1x8x128xf32> to vector<8x128xf32>
    %10 = arith.addf %7, %9 : vector<8x128xf32>
    %c0_6 = arith.constant 0 : index
    %c0_7 = arith.constant 0 : index
    %11 = vector.load %arg5[%c0_6, %c0_7] : memref<8x128xf32, #tpu.memory_space<vmem>>, vector<8x128xf32>
    tpu.vector_store %arg5[%c0_6, %c0_7], %10 {strides = array<i32>} : memref<8x128xf32, #tpu.memory_space<vmem>>, vector<8x128xf32>,
    %c0_i32_8 = arith.constant 0 : i32
    %12 = arith.cmpi eq, %arg1, %c0_i32_8 : i32
    %13 = arith.extui %12 : i1 to i32
    %c0_i32_9 = arith.constant 0 : i32
    %14 = arith.cmpi ne, %13, %c0_i32_9 : i32
    scf.if %14 {
      %c0_10 = arith.constant 0 : index
      %c0_11 = arith.constant 0 : index
      %15 = vector.load %arg5[%c0_10, %c0_11] : memref<8x128xf32, #tpu.memory_space<vmem>>, vector<8x128xf32>
      %16 = vector.shape_cast %15 : vector<8x128xf32> to vector<1x8x128xf32>
      %cst_12 = arith.constant dense<0.000000e+00> : vector<1xf32>
      %17 = vector.multi_reduction <add>, %16, %cst_12 [1, 2] : vector<1x8x128xf32> to vector<1xf32>
      %18 = vector.shape_cast %17 : vector<1xf32> to vector<1x1x1xf32>
      %19 = vector.extract %18[0, 0, 0] : f32 from vector<1x1x1xf32>
      %c0_13 = arith.constant 0 : index
      %c0_14 = arith.constant 0 : index
      %20 = memref.load %arg4[%c0_13, %c0_14] : memref<1x1xf32, #tpu.memory_space<smem>>
      memref.store %19, %arg4[%c0_13, %c0_14] : memref<1x1xf32, #tpu.memory_space<smem>>
    } else {
    }
    return
  }
  func.func @transform_0(%arg0: i32, %arg1: i32) -> (i32, i32) {
    %c1_i32 = arith.constant 1 : i32
    %0 = arith.muli %arg0, %c1_i32 : i32
    %1 = arith.addi %0, %arg1 : i32
    %c0_i32 = arith.constant 0 : i32
    %c0_i32_0 = arith.constant 0 : i32
    return %1, %c0_i32 : i32, i32
  }
  func.func @transform_1(%arg0: i32, %arg1: i32) -> (i32, i32) {
    %c1_i32 = arith.constant 1 : i32
    %0 = arith.muli %arg0, %c1_i32 : i32
    %1 = arith.addi %0, %arg1 : i32
    %c0_i32 = arith.constant 0 : i32
    %c0_i32_0 = arith.constant 0 : i32
    return %1, %c0_i32 : i32, i32
  }
  func.func @transform_2(%arg0: i32, %arg1: i32) -> (i32, i32) {
    %c0_i32 = arith.constant 0 : i32
    %c0_i32_0 = arith.constant 0 : i32
    return %arg0, %c0_i32 : i32, i32
  }
}

</mosaic_0001>

<bundles_post_ra>
// kernel: tpu_custom_call.1
= control target key start
LH: loop header
LB: loop body
LE: loop exit
PB: predicated region body
PF: predicated region fallthrough
CT: control target
= control target key end

     0   :  { %7 = vsyncpa [#allocation4], 0  ;;  %s173_s0 = inlined_call_operand.hbm [shape: f32[8,128], index: 0, kind: input, shape index: {}]   ;;  %s174_s1 = inlined_call_operand.hbm [shape: f32[8,128], index: 1, kind: input, shape index: {}]   ;;  %s175_s2 = inlined_call_operand.hbm [shape: f32[1,1], index: 2, kind: output, shape index: {}]  }
   0x1   :  { %8 = vsyncpa [#allocation7], 0 }
   0x2   :  { %9 = vsyncpa [#allocation5], 0  ;;  %s146_s9 = smov [#allocation3]   ;;  %s147_s11 = smov [#allocation6]  }
   0x3   :  { %s19_s10 = sshll.u32 %s146_s9, 4  ;;  %s32_s12 = sshll.u32 %s147_s11, 4  ;;  %s20_s10 = int_to_ptr.vmem [resolvable:$true] %s19_s10  ;;  %s33_s12 = int_to_ptr.vmem [resolvable:$true] %s32_s12 }
   0x4   :  { %s100_s13 = scalar_lea.vmem %s20_s10, 128  ;;  %p105_p1 = scmp.lt.s32.totalorder %s20_s10, %s20_s10 }
   0x5   :  { %p101_p0 = scmp.ne.s32.totalorder %s20_s10, %s100_s13  ;;  %p106_p2 = scmp.lt.s32.totalorder %s100_s13, %s100_s13 }
   0x7   :  { %p107_p3 = por %p106_p2, %p105_p1 }
   0x9   :  { %p108_p4 = pnand %p107_p3, %p101_p0 }
   0xb   :  { %111 = shalt.err (!%p108_p4)
}
   0xc   :  { %22 = dma.hbm_to_vmem [thread:$0]  %s173_s0, 128, %s20_s10, [#allocation4]  }
   0xd   :  { %s120_s16 = scalar_lea.vmem %s33_s12, 128  ;;  %p125_p6 = scmp.lt.s32.totalorder %s33_s12, %s33_s12 }
   0xe   :  { %p121_p5 = scmp.ne.s32.totalorder %s33_s12, %s120_s16  ;;  %p126_p7 = scmp.lt.s32.totalorder %s120_s16, %s120_s16 }
  0x10   :  { %p127_p8 = por %p126_p7, %p125_p6 }
  0x12   :  { %p128_p9 = pnand %p127_p8, %p121_p5 }
  0x14   :  { %131 = shalt.err (!%p128_p9)
}
  0x15   :  { %35 = dma.hbm_to_vmem [thread:$0]  %s174_s1, 128, %s33_s12, [#allocation7]  }
  0x16   :  { %140 = dma.done.wait [#allocation4], 128  }
  0x17   :  { %141 = vsyncadd [#allocation4], 4294967168 }
  0x18   :  { %142 = dma.done.wait [#allocation7], 128  }
  0x19   :  { %143 = vsyncadd [#allocation7], 4294967168  ;;  %v49_v0 = vld [vmem:[#allocation3] sm:$0xff]  ;;  %v50_v1 = vld [vmem:[#allocation6] sm:$0xff]  ;;  %s148_s1 = smov [#allocation8]  }
  0x1a   :  { %v51_v2 = vsub.f32 %v49_v0, %v50_v1 }
  0x1c   :  { %v52_v3 = vand.u32 2147483647, %v51_v2 }
  0x1e   :  { %61 = vadd.xlane.f32.xlu0 %v52_v3 }
  0xa7   :  { %v62_v4 = vpop.xlane.xlu0 %61 }
  0xa8   :  { %v63_v5 = vrot.slane %v62_v4, 4 }
  0xaa   :  { %v64_v6 = vadd.f32 %v63_v5, %v62_v4 }
  0xac   :  { %v65_v7 = vrot.slane %v64_v6, 2 }
  0xae   :  { %v66_v8 = vadd.f32 %v65_v7, %v64_v6 }
  0xb0   :  { %v67_v9 = vrot.slane %v66_v8, 1 }
  0xb2   :  { %v68_v10 = vadd.f32 %v67_v9, %v66_v8 }
  0xb4   :  { %87 = vpush %v68_v10 }
  0xe5   :  { %s88_s0 = spop %87 }
  0xe6   :  { %71 = sst [smem:[#allocation8]] %s88_s0 }
  0xe7   :  { %79 = dma.smem_to_hbm %s148_s1, 16, %s175_s2, [#allocation5]  }
  0xe8   :  { %144 = dma.done.wait [#allocation5], 16  }
  0xe9   :  { %145 = vsyncadd [#allocation5], 4294967280 }
  0xea   :  { %83 = sfence }
  0xeb   :  { %84 = vsyncpa [#allocation4], 1 }
  0xec   :  { %85 = vsyncpa [#allocation7], 1 }
  0xed   :  { %86 = vsyncpa [#allocation5], 1 }

</bundles_post_ra>
